<compile_context>
chip_gen: v6e
topology: v6e:2x2x1
jax: 0.10.0
libtpu: 0.0.40
codegen_flags: <defaults>
</compile_context>

<pallas_src>
import jax
import jax.numpy as jnp
from jax import lax
from jax.experimental import pallas as pl
from jax.experimental.pallas import tpu as pltpu

LANE = 128
SUBLANE = 8


def _round_up(x, m):
    return ((x + m - 1) // m) * m


def _pad2d(a, rows, cols):
    return jnp.pad(a, ((0, rows - a.shape[0]), (0, cols - a.shape[1])))


def make_attention_kernel(scale, block_b, s_pad, s_true, kq_p, vs_p, key_chunk):
    """scale = 1/sqrt(UNPADDED key_query_size), baked in as a compile-time const."""

    def kernel(x_ref, wqkv_ref, bqkv_ref, wo_ref, bo_ref, o_ref):
        ep = x_ref.shape[-1]
        m_rows = block_b * s_pad

        # Fused QKV projection on a lane/sublane-dense (bb*S, Ep) bf16 slab;
        # f32 accumulation on the MXU.  (s_pad % 8 == 0 -> reshape is free.)
        x2 = x_ref[...].reshape(m_rows, ep).astype(jnp.bfloat16)
        qkv = (jnp.dot(x2, wqkv_ref[...], preferred_element_type=jnp.float32)
               + bqkv_ref[...])

        # 128-aligned lane slices (free); fold 1/sqrt(d_k) into Q.
        q = qkv[:, :kq_p] * scale
        k = qkv[:, kq_p:2 * kq_p]
        v = qkv[:, 2 * kq_p:]
        q3 = q.reshape(block_b, s_pad, kq_p).astype(jnp.bfloat16)
        k3 = k.reshape(block_b, s_pad, kq_p).astype(jnp.bfloat16)
        v3 = v.reshape(block_b, s_pad, vs_p).astype(jnp.bfloat16)

        # Online softmax over key chunks: never materializes a full SxS score
        # matrix (bounded VMEM at large S).  Softmax math in f32 on all chips.
        m_i = jnp.full((block_b, s_pad, 1), -jnp.inf, jnp.float32)
        l_i = jnp.zeros((block_b, s_pad, 1), jnp.float32)
        acc = jnp.zeros((block_b, s_pad, vs_p), jnp.float32)

        n_chunks = pl.cdiv(s_pad, key_chunk)
        for c in range(n_chunks):
            lo = c * key_chunk
            hi = min(lo + key_chunk, s_pad)
            k_c = k3[:, lo:hi, :]
            v_c = v3[:, lo:hi, :]

            # Batched QK^T contraction -- no explicit transpose materialized.
            s = jnp.einsum('bqd,bkd->bqk', q3, k_c,
                           preferred_element_type=jnp.float32)
            if hi > s_true:  # chunk contains padded key rows -> mask them out
                key_idx = lo + lax.broadcasted_iota(jnp.int32, (1, 1, hi - lo), 2)
                s = jnp.where(key_idx < s_true, s, -1e30)

            m_new = jnp.maximum(m_i, jnp.max(s, axis=-1, keepdims=True))
            alpha = jnp.exp(m_i - m_new)                      # EUP slot
            p = jnp.exp(s - m_new)
            l_i = alpha * l_i + jnp.sum(p, axis=-1, keepdims=True)
            # bf16 probabilities into the A@V matmul; f32 accumulation.
            acc = alpha * acc + jnp.einsum('bqk,bkd->bqd',
                                           p.astype(jnp.bfloat16), v_c,
                                           preferred_element_type=jnp.float32)
            m_i = m_new

        h = acc * pl.reciprocal(l_i, approx=True)             # EUP slot

        out = (jnp.dot(h.reshape(m_rows, vs_p).astype(jnp.bfloat16), wo_ref[...],
                       preferred_element_type=jnp.float32) + bo_ref[...])
        o_ref[...] = out.reshape(block_b, s_pad, ep).astype(o_ref.dtype)

    return kernel


def _per_batch_vmem_bytes(s_pad, ep, f, vs_p, key_chunk):
    x_blk = 2 * s_pad * ep * 4            # f32 input block, double-buffered
    out_blk = 2 * s_pad * ep * 4          # f32 output block, double-buffered
    qkv = s_pad * f * (4 + 2)             # f32 qkv slab + bf16 q/k/v casts
    scores = 2 * s_pad * key_chunk * 4    # s and p for one key chunk (f32)
    acc = s_pad * (vs_p * 4 + 8)          # f32 acc + m/l carries
    tail = s_pad * (vs_p * 2 + ep * 4)    # bf16 h + f32 pre-store slab
    return x_blk + out_blk + qkv + scores + acc + tail


def _fixed_vmem_bytes(ep, f, vs_p):
    w = 2 * (ep * f + vs_p * ep) * 2      # bf16 weights, double-buffered
    b = 2 * (f + ep) * 4                  # f32 biases, double-buffered
    return w + b + (2 << 20)              # + compiler scratch slack


def _pick_block_batch(batch, per_batch_bytes, fixed_bytes, budget_bytes, s_pad):
    divisors = [d for d in range(batch, 0, -1) if batch % d == 0]
    fitting = [d for d in divisors
               if fixed_bytes + d * per_batch_bytes <= budget_bytes] or [1]
    bb = fitting[0]                       # largest bb that fits the VMEM budget
    # Give up rows for cross-core grid parallelism (v7x has 2 TCs) only when
    # the MXU M dimension stays filled; on 1-TC v5e/v6e the largest bb wins.
    for d in fitting:
        if batch // d >= 2 and d * s_pad >= 256:
            bb = d
            break
    return bb


def attention_layer(x, wq, bq, wk, bk, wv, bv, wo, bo, *, trim_output=True):
    """x: (B, S, E); weights pre-transposed to (in, out); biases (1, out)."""
    B, S, E = x.shape
    KQ = wq.shape[1]
    VS = wv.shape[1]

    Ep = _round_up(E, LANE)
    KQp = _round_up(KQ, LANE)
    VSp = _round_up(VS, LANE)
    Sp = _round_up(S, SUBLANE)
    F = 2 * KQp + VSp

    # Zero-pad feature dims to lane-dense multiples of 128 and S to a multiple
    # of 8 (layout-preserving reshapes).  Padding is exact: padded weight
    # rows/cols and bias entries are zero; padded key rows are masked in-kernel.
    xp = jnp.pad(x, ((0, 0), (0, Sp - S), (0, Ep - E)))
    wqkv = jnp.concatenate([_pad2d(wq, Ep, KQp),
                            _pad2d(wk, Ep, KQp),
                            _pad2d(wv, Ep, VSp)], axis=1).astype(jnp.bfloat16)
    bqkv = jnp.concatenate([_pad2d(bq, 1, KQp),
                            _pad2d(bk, 1, KQp),
                            _pad2d(bv, 1, VSp)], axis=1)          # f32
    wo_p = _pad2d(wo, VSp, Ep).astype(jnp.bfloat16)
    bo_p = _pad2d(bo, 1, Ep)                                      # f32

    key_chunk = min(Sp, 512)

    # VMEM budget from the actual chip (fallback: 64 MiB = v7x per-TC, the
    # most restrictive generation).
    try:
        vmem_cap = int(pltpu.get_tpu_info().vmem_capacity_bytes)
    except Exception:
        vmem_cap = 64 * 1024 * 1024
    budget = max(int(vmem_cap * 0.65), 24 * 1024 * 1024)
    vmem_limit = max(min(int(vmem_cap * 0.85), 100 * 1024 * 1024),
                     32 * 1024 * 1024)

    per_b = _per_batch_vmem_bytes(Sp, Ep, F, VSp, key_chunk)
    fixed = _fixed_vmem_bytes(Ep, F, VSp)
    bb = _pick_block_batch(B, per_b, fixed, budget, Sp)
    grid = (B // bb,)

    # Scale uses the UNPADDED key_query_size (K.size(-1) in the module).
    scale = 1.0 / (KQ ** 0.5)
    kernel = make_attention_kernel(scale, bb, Sp, S, KQp, VSp, key_chunk)

    full = lambda shape: pl.BlockSpec(shape, lambda b: (0,) * len(shape))

    flops = 2 * B * Sp * (Ep * F + Sp * KQp + Sp * VSp + VSp * Ep)
    bytes_accessed = int(4 * xp.size + 4 * B * Sp * Ep
                         + 2 * (wqkv.size + wo_p.size)
                         + 4 * (bqkv.size + bo_p.size))
    cost = pl.CostEstimate(flops=int(flops),
                           transcendentals=int(B * Sp * (Sp + 1)),
                           bytes_accessed=bytes_accessed)

    out_p = pl.pallas_call(
        kernel,
        out_shape=jax.ShapeDtypeStruct((B, Sp, Ep), x.dtype),
        grid_spec=pltpu.PrefetchScalarGridSpec(
            num_scalar_prefetch=0,
            grid=grid,
            in_specs=[
                pl.BlockSpec((bb, Sp, Ep), lambda b: (b, 0, 0)),  # x
                full(wqkv.shape), full(bqkv.shape),               # fused QKV
                full(wo_p.shape), full(bo_p.shape),               # out proj
            ],
            out_specs=pl.BlockSpec((bb, Sp, Ep), lambda b: (b, 0, 0)),
        ),
        compiler_params=pltpu.CompilerParams(
            dimension_semantics=("parallel",),
            vmem_limit_bytes=int(vmem_limit)),
        cost_estimate=cost,
    )(xp, wqkv, bqkv, wo_p, bo_p)

    if trim_output:
        # Extra HBM pass; consumers that tolerate 128-padded features should
        # pass trim_output=False and fuse the slice downstream.
        return out_p[:, :S, :E]
    return out_p


def init_linear(key, in_features, out_features):
    """Deterministic init mimicking nn.Linear's U(-1/sqrt(in), 1/sqrt(in)).
    Returns weight already transposed to (in, out) and bias as (1, out)."""
    kw, kb = jax.random.split(key)
    bound = 1.0 / (in_features ** 0.5)
    w = jax.random.uniform(kw, (in_features, out_features), jnp.float32,
                           minval=-bound, maxval=bound)
    b = jax.random.uniform(kb, (1, out_features), jnp.float32,
                           minval=-bound, maxval=bound)
    return w, b


if __name__ == "__main__":
    # Small shapes consistent with the module's forward pass.
    B, S = 2, 8
    embedding_size, key_query_size, value_size = 32, 16, 16

    root = jax.random.PRNGKey(0)
    kx, kq, kk, kv, ko = jax.random.split(root, 5)

    x = jax.random.normal(kx, (B, S, embedding_size), jnp.float32)

    wq, bq = init_linear(kq, embedding_size, key_query_size)
    wk, bk = init_linear(kk, embedding_size, key_query_size)
    wv, bv = init_linear(kv, embedding_size, value_size)
    wo, bo = init_linear(ko, value_size, embedding_size)

    out = attention_layer(x, wq, bq, wk, bk, wv, bv, wo, bo)
    out = jax.block_until_ready(out)

    # Pure-JAX f32 reference (eval-mode dropout == identity).  Tolerance is
    # relaxed because the kernel runs the MXU in bf16 (f32 accumulation) and
    # uses the approximate EUP reciprocal in the softmax normalization.
    q = x @ wq + bq
    k = x @ wk + bk
    v = x @ wv + bv
    a = jax.nn.softmax((q @ jnp.swapaxes(k, -2, -1)) / (key_query_size ** 0.5),
                       axis=-1)
    ref = (a @ v) @ wo + bo
    max_err = float(jnp.max(jnp.abs(out - ref)))
    assert jnp.allclose(out, ref, atol=3e-2, rtol=3e-2), \
        f"mismatch vs reference, max|err|={max_err}"

    print("KERNEL_OK")
</pallas_src>

<mosaic_0001>
module attributes {stable_mosaic.version = 11 : i64} {
  func.func @kernel(%arg0: i32, %arg1: memref<2x8x128xf32, #tpu.memory_space<vmem>>, %arg2: memref<128x384xbf16, #tpu.memory_space<vmem>>, %arg3: memref<1x384xf32, #tpu.memory_space<vmem>>, %arg4: memref<128x128xbf16, #tpu.memory_space<vmem>>, %arg5: memref<1x128xf32, #tpu.memory_space<vmem>>, %arg6: memref<2x8x128xf32, #tpu.memory_space<vmem>>) attributes {dimension_semantics = [#tpu.dimension_semantics<parallel>], iteration_bounds = array<i64: 1>, scalar_prefetch = 0 : i64, scratch_operands = 0 : i64, tpu.core_type = #tpu.core_type<tc>, window_params = [{transform_indices = @transform_0, window_bounds = array<i64: 2, 8, 128>}, {pipeline_mode = #tpu.pipeline_mode<synchronous>, transform_indices = @transform_1, window_bounds = array<i64: 128, 384>}, {pipeline_mode = #tpu.pipeline_mode<synchronous>, transform_indices = @transform_2, window_bounds = array<i64: 1, 384>}, {pipeline_mode = #tpu.pipeline_mode<synchronous>, transform_indices = @transform_3, window_bounds = array<i64: 128, 128>}, {pipeline_mode = #tpu.pipeline_mode<synchronous>, transform_indices = @transform_4, window_bounds = array<i64: 1, 128>}, {transform_indices = @transform_5, window_bounds = array<i64: 2, 8, 128>}]} {
    %c0 = arith.constant 0 : index
    %c0_0 = arith.constant 0 : index
    %c0_1 = arith.constant 0 : index
    %0 = vector.load %arg1[%c0, %c0_0, %c0_1] : memref<2x8x128xf32, #tpu.memory_space<vmem>>, vector<2x8x128xf32>
    %1 = vector.shape_cast %0 : vector<2x8x128xf32> to vector<16x128xf32>
    %2 = arith.truncf %1 : vector<16x128xf32> to vector<16x128xbf16>
    %c0_2 = arith.constant 0 : index
    %c0_3 = arith.constant 0 : index
    %3 = vector.load %arg2[%c0_2, %c0_3] : memref<128x384xbf16, #tpu.memory_space<vmem>>, vector<128x384xbf16>
    %cst = arith.constant dense<0.000000e+00> : vector<16x384xf32>
    %4 = tpu.matmul %2, %3, %cst {dimension_numbers = #tpu.dot_dimension_numbers<[1], [0], [0], [1], [0, 0, 1, 1], [], []>} : vector<16x128xbf16>, vector<128x384xbf16>, vector<16x384xf32> -> vector<16x384xf32>
    %c0_4 = arith.constant 0 : index
    %c0_5 = arith.constant 0 : index
    %5 = vector.load %arg3[%c0_4, %c0_5] : memref<1x384xf32, #tpu.memory_space<vmem>>, vector<1x384xf32>
    %6 = vector.broadcast %5 : vector<1x384xf32> to vector<16x384xf32>
    %7 = arith.addf %4, %6 : vector<16x384xf32>
    %8 = vector.extract_strided_slice %7 {offsets = [0, 0], sizes = [16, 128], strides = [1, 1]} : vector<16x384xf32> to vector<16x128xf32>
    %cst_6 = arith.constant 2.500000e-01 : f32
    %9 = vector.broadcast %cst_6 : f32 to vector<16x128xf32>
    %10 = arith.mulf %8, %9 : vector<16x128xf32>
    %11 = vector.extract_strided_slice %7 {offsets = [0, 128], sizes = [16, 128], strides = [1, 1]} : vector<16x384xf32> to vector<16x128xf32>
    %12 = vector.extract_strided_slice %7 {offsets = [0, 256], sizes = [16, 128], strides = [1, 1]} : vector<16x384xf32> to vector<16x128xf32>
    %13 = vector.shape_cast %10 : vector<16x128xf32> to vector<2x8x128xf32>
    %14 = arith.truncf %13 : vector<2x8x128xf32> to vector<2x8x128xbf16>
    %15 = vector.shape_cast %11 : vector<16x128xf32> to vector<2x8x128xf32>
    %16 = arith.truncf %15 : vector<2x8x128xf32> to vector<2x8x128xbf16>
    %17 = vector.shape_cast %12 : vector<16x128xf32> to vector<2x8x128xf32>
    %18 = arith.truncf %17 : vector<2x8x128xf32> to vector<2x8x128xbf16>
    %cst_7 = arith.constant 0xFF800000 : f32
    %19 = vector.broadcast %cst_7 : f32 to vector<2x8x1xf32>
    %cst_8 = arith.constant 0.000000e+00 : f32
    %20 = vector.broadcast %cst_8 : f32 to vector<2x8x1xf32>
    %cst_9 = arith.constant 0.000000e+00 : f32
    %21 = vector.broadcast %cst_9 : f32 to vector<2x8x128xf32>
    "tpu.trace_start"() <{level = 10 : i32, message = "bqd,bkd->bqk"}> : () -> ()
    %cst_10 = arith.constant dense<0.000000e+00> : vector<2x8x8xf32>
    %22 = tpu.matmul %14, %16, %cst_10 {dimension_numbers = #tpu.dot_dimension_numbers<[2], [2], [1], [1], [0, 0, 0, 1, 1, 1], [0], [0]>} : vector<2x8x128xbf16>, vector<2x8x128xbf16>, vector<2x8x8xf32> -> vector<2x8x8xf32>
    "tpu.trace_stop"() : () -> ()
    %cst_11 = arith.constant dense<0xFF800000> : vector<2x8xf32>
    %23 = vector.multi_reduction <maximumf>, %22, %cst_11 [2] : vector<2x8x8xf32> to vector<2x8xf32>
    %24 = vector.shape_cast %23 : vector<2x8xf32> to vector<2x8x1xf32>
    %25 = arith.maximumf %19, %24 : vector<2x8x1xf32>
    %26 = arith.subf %19, %25 : vector<2x8x1xf32>
    %27 = math.exp %26 : vector<2x8x1xf32>
    %28 = vector.broadcast %25 : vector<2x8x1xf32> to vector<2x8x8xf32>
    %29 = arith.subf %22, %28 : vector<2x8x8xf32>
    %30 = math.exp %29 : vector<2x8x8xf32>
    %31 = arith.mulf %27, %20 : vector<2x8x1xf32>
    %cst_12 = arith.constant dense<0.000000e+00> : vector<2x8xf32>
    %32 = vector.multi_reduction <add>, %30, %cst_12 [2] : vector<2x8x8xf32> to vector<2x8xf32>
    %33 = vector.shape_cast %32 : vector<2x8xf32> to vector<2x8x1xf32>
    %34 = arith.addf %31, %33 : vector<2x8x1xf32>
    %35 = vector.broadcast %27 : vector<2x8x1xf32> to vector<2x8x128xf32>
    %36 = arith.mulf %35, %21 : vector<2x8x128xf32>
    %37 = arith.truncf %30 : vector<2x8x8xf32> to vector<2x8x8xbf16>
    "tpu.trace_start"() <{level = 10 : i32, message = "bqk,bkd->bqd"}> : () -> ()
    %cst_13 = arith.constant dense<0.000000e+00> : vector<2x8x128xf32>
    %38 = tpu.matmul %37, %18, %cst_13 {dimension_numbers = #tpu.dot_dimension_numbers<[2], [1], [1], [2], [0, 0, 0, 1, 1, 2], [0], [0]>} : vector<2x8x8xbf16>, vector<2x8x128xbf16>, vector<2x8x128xf32> -> vector<2x8x128xf32>
    "tpu.trace_stop"() : () -> ()
    %39 = arith.addf %36, %38 : vector<2x8x128xf32>
    %40 = tpu.reciprocal %34 {approx = true} : vector<2x8x1xf32> -> vector<2x8x1xf32>
    %41 = vector.broadcast %40 : vector<2x8x1xf32> to vector<2x8x128xf32>
    %42 = arith.mulf %39, %41 : vector<2x8x128xf32>
    %43 = vector.shape_cast %42 : vector<2x8x128xf32> to vector<16x128xf32>
    %44 = arith.truncf %43 : vector<16x128xf32> to vector<16x128xbf16>
    %c0_14 = arith.constant 0 : index
    %c0_15 = arith.constant 0 : index
    %45 = vector.load %arg4[%c0_14, %c0_15] : memref<128x128xbf16, #tpu.memory_space<vmem>>, vector<128x128xbf16>
    %cst_16 = arith.constant dense<0.000000e+00> : vector<16x128xf32>
    %46 = tpu.matmul %44, %45, %cst_16 {dimension_numbers = #tpu.dot_dimension_numbers<[1], [0], [0], [1], [0, 0, 1, 1], [], []>} : vector<16x128xbf16>, vector<128x128xbf16>, vector<16x128xf32> -> vector<16x128xf32>
    %c0_17 = arith.constant 0 : index
    %c0_18 = arith.constant 0 : index
    %47 = vector.load %arg5[%c0_17, %c0_18] : memref<1x128xf32, #tpu.memory_space<vmem>>, vector<1x128xf32>
    %48 = vector.broadcast %47 : vector<1x128xf32> to vector<16x128xf32>
    %49 = arith.addf %46, %48 : vector<16x128xf32>
    %50 = vector.shape_cast %49 : vector<16x128xf32> to vector<2x8x128xf32>
    %c0_19 = arith.constant 0 : index
    %c0_20 = arith.constant 0 : index
    %c0_21 = arith.constant 0 : index
    %51 = vector.load %arg6[%c0_19, %c0_20, %c0_21] : memref<2x8x128xf32, #tpu.memory_space<vmem>>, vector<2x8x128xf32>
    tpu.vector_store %arg6[%c0_19, %c0_20, %c0_21], %50 {strides = array<i32>} : memref<2x8x128xf32, #tpu.memory_space<vmem>>, vector<2x8x128xf32>,
    return
  }
  func.func @transform_0(%arg0: i32) -> (i32, i32, i32) {
    %c0_i32 = arith.constant 0 : i32
    %c0_i32_0 = arith.constant 0 : i32
    %c0_i32_1 = arith.constant 0 : i32
    return %arg0, %c0_i32, %c0_i32_0 : i32, i32, i32
  }
  func.func @transform_1(%arg0: i32) -> (i32, i32) {
    %c0_i32 = arith.constant 0 : i32
    %c0_i32_0 = arith.constant 0 : i32
    %c0_i32_1 = arith.constant 0 : i32
    return %c0_i32, %c0_i32_0 : i32, i32
  }
  func.func @transform_2(%arg0: i32) -> (i32, i32) {
    %c0_i32 = arith.constant 0 : i32
    %c0_i32_0 = arith.constant 0 : i32
    %c0_i32_1 = arith.constant 0 : i32
    return %c0_i32, %c0_i32_0 : i32, i32
  }
  func.func @transform_3(%arg0: i32) -> (i32, i32) {
    %c0_i32 = arith.constant 0 : i32
    %c0_i32_0 = arith.constant 0 : i32
    %c0_i32_1 = arith.constant 0 : i32
    return %c0_i32, %c0_i32_0 : i32, i32
  }
  func.func @transform_4(%arg0: i32) -> (i32, i32) {
    %c0_i32 = arith.constant 0 : i32
    %c0_i32_0 = arith.constant 0 : i32
    %c0_i32_1 = arith.constant 0 : i32
    return %c0_i32, %c0_i32_0 : i32, i32
  }
  func.func @transform_5(%arg0: i32) -> (i32, i32, i32) {
    %c0_i32 = arith.constant 0 : i32
    %c0_i32_0 = arith.constant 0 : i32
    %c0_i32_1 = arith.constant 0 : i32
    return %arg0, %c0_i32, %c0_i32_0 : i32, i32, i32
  }
}

</mosaic_0001>

<bundles_post_ra>
// kernel: tpu_custom_call.1
= control target key start
LH: loop header
LB: loop body
LE: loop exit
PB: predicated region body
PF: predicated region fallthrough
CT: control target
= control target key end

     0   :  { %10 = vsyncpa [#allocation3], 0  ;;  %s1059_s0 = inlined_call_operand.hbm [shape: f32[2,8,128], index: 0, kind: input, shape index: {}]   ;;  %s1060_s1 = inlined_call_operand.hbm [shape: bf16[128,384], index: 1, kind: input, shape index: {}]   ;;  %s1061_s2 = inlined_call_operand.vmem [shape: f32[1,384], index: 2, kind: input, shape index: {}]   ;;  %s1062_s3 = inlined_call_operand.hbm [shape: bf16[128,128], index: 3, kind: input, shape index: {}]   ;;  %s1063_s4 = inlined_call_operand.vmem [shape: f32[1,128], index: 4, kind: input, shape index: {}]   ;;  %s1064_s5 = inlined_call_operand.hbm [shape: f32[2,8,128], index: 5, kind: output, shape index: {}]  }
   0x1   :  { %11 = vsyncpa [#allocation6], 0 }
   0x2   :  { %12 = vsyncpa [#allocation4], 0  ;;  %s954_s18 = smov [#allocation5]  }
   0x3   :  { %s30_s19 = sshll.u32 %s954_s18, 4  ;;  %s31_s19 = int_to_ptr.vmem [resolvable:$true] %s30_s19 }
   0x4   :  { %s876_s20 = scalar_lea.vmem %s31_s19, 3072  ;;  %p881_p1 = scmp.lt.s32.totalorder %s31_s19, %s31_s19 }
   0x5   :  { %p877_p0 = scmp.ne.s32.totalorder %s31_s19, %s876_s20  ;;  %p882_p2 = scmp.lt.s32.totalorder %s876_s20, %s876_s20 }
   0x7   :  { %p883_p3 = por %p882_p2, %p881_p1 }
   0x9   :  { %p884_p4 = pnand %p883_p3, %p877_p0 }
   0xb   :  { %887 = shalt.err (!%p884_p4)
}
   0xc   :  { %s955_s21 = smov 192   ;;  %s956_s22 = smov 12  }
   0xd   :  { %36 = dma.hbm_to_vmem [thread:$0]  %s1060_s1, 3072, %s31_s19, [#allocation6], %s955_s21, %s955_s21, %s956_s22  }
   0xe   :  { %s957_s25 = smov [#allocation2]  }
   0xf   :  { %s18_s26 = sshll.u32 %s957_s25, 4  ;;  %s19_s26 = int_to_ptr.vmem [resolvable:$true] %s18_s26 }
  0x10   :  { %s896_s27 = scalar_lea.vmem %s19_s26, 256  ;;  %p901_p6 = scmp.lt.s32.totalorder %s19_s26, %s19_s26 }
  0x11   :  { %p897_p5 = scmp.ne.s32.totalorder %s19_s26, %s896_s27  ;;  %p902_p7 = scmp.lt.s32.totalorder %s896_s27, %s896_s27 }
  0x13   :  { %p903_p8 = por %p902_p7, %p901_p6 }
  0x15   :  { %p904_p9 = pnand %p903_p8, %p897_p5 }
  0x17   :  { %907 = shalt.err (!%p904_p9)
}
  0x18   :  { %s958_s28 = smov 128   ;;  %s959_s29 = smov 8  }
  0x19   :  { %24 = dma.hbm_to_vmem [thread:$0]  %s1059_s0, 256, %s19_s26, [#allocation3], %s958_s28, %s958_s28, %s959_s29  }
  0x1a   :  { %s960_s1 = smov [#allocation7]  }
  0x1b   :  { %s44_s7 = sshll.u32 %s960_s1, 4  ;;  %s45_s7 = int_to_ptr.vmem [resolvable:$true] %s44_s7 }
  0x1c   :  { %s916_s8 = scalar_lea.vmem %s45_s7, 1024  ;;  %p921_p11 = scmp.lt.s32.totalorder %s45_s7, %s45_s7 }
  0x1d   :  { %p917_p10 = scmp.ne.s32.totalorder %s45_s7, %s916_s8  ;;  %p922_p12 = scmp.lt.s32.totalorder %s916_s8, %s916_s8 }
  0x1f   :  { %p923_p13 = por %p922_p12, %p921_p11 }
  0x21   :  { %p924_p0 = pnand %p923_p13, %p917_p10 }
  0x23   :  { %927 = shalt.err (!%p924_p0)
}
  0x24   :  { %s961_s9 = smov 64   ;;  %s962_s10 = smov 4  }
  0x25   :  { %50 = dma.hbm_to_vmem [thread:$0]  %s1062_s3, 1024, %s45_s7, [#allocation6], %s961_s9, %s961_s9, %s962_s10  }
  0x26   :  { %948 = dma.done.wait [#allocation3], 256  }
  0x27   :  { %949 = vsyncadd [#allocation3], 4294967040 }
  0x28   :  { %950 = dma.done.wait [#allocation6], 4096  }
  0x29   :  { %951 = vsyncadd [#allocation6], 4294963200  ;;  %v963_v0 = vmov 0   ;;  %v964_v1 = vmov 0.0   ;;  %v816_v2 = vld [vmem:[#allocation5 + $0xac] ss:$12 sps:$4 sm:$0xff]   ;;  %v100_v29 = vlaneseq }
  0x2a   :  { %275 = vmatprep.mubr.bf16.mxu0 %v963_v0  ;;  %739 = vmatprep.subr.bf16.mxu1 %v964_v1  ;;  %v818_v3 = vld [vmem:[#allocation5 + $0xa8] ss:$12 sps:$4 sm:$0xff]   ;;  %v821_v5 = vld [vmem:[#allocation5 + $0x90] ss:$12 sps:$4 sm:$0xff]   ;;  %v824_v7 = vld [vmem:[#allocation5 + $0x78] ss:$12 sps:$4 sm:$0xff]  }
  0x2b   :  { %243 = vmatprep.subr.bf16.mxu0 %v816_v2  ;;  %v819_v4 = vld [vmem:[#allocation5 + $0x94] ss:$12 sps:$4 sm:$0xff]   ;;  %v822_v6 = vld [vmem:[#allocation5 + $0x7c] ss:$12 sps:$4 sm:$0xff]   ;;  %v825_v8 = vld [vmem:[#allocation5 + $0x64] ss:$12 sps:$4 sm:$0xff]  }
  0x2c   :  { %244 = vmatpush1.bf16.msra.mxu0 %v818_v3  ;;  %v827_v9 = vld [vmem:[#allocation5 + $0x60] ss:$12 sps:$4 sm:$0xff]   ;;  %v840_v11 = vld [vmem:[#allocation5 + $0xb0] ss:$12 sps:$4 sm:$0xff]   ;;  %v841_v12 = vld [vmem:[#allocation5 + $0x98] ss:$12 sps:$4 sm:$0xff]  }
  0x2d   :  { %245 = vmatprep.subr.bf16.mxu0 %v819_v4  ;;  %v828_v10 = vld [vmem:[#allocation5 + $0x4c] ss:$12 sps:$4 sm:$0xff]   ;;  %740 = vmatpush3.bf16.msra.mxu1 %v840_v11  ;;  %v830_v13 = vld [vmem:[#allocation5 + $0x48] ss:$12 sps:$4 sm:$0xff]   ;;  %v833_v16 = vld [vmem:[#allocation5 + $0x30] ss:$12 sps:$4 sm:$0xff]  }
  0x2e   :  { %741 = vmatprep.subr.bf16.mxu1 %v964_v1  ;;  %v831_v14 = vld [vmem:[#allocation5 + $0x34] ss:$12 sps:$4 sm:$0xff]   ;;  %v834_v17 = vld [vmem:[#allocation5 + $0x1c] ss:$12 sps:$4 sm:$0xff]   ;;  %v836_v19 = vld [vmem:[#allocation5 + $0x18] ss:$12 sps:$4 sm:$0xff]  }
  0x2f   :  { %v842_v15 = vld [vmem:[#allocation5 + $0x80] ss:$12 sps:$4 sm:$0xff]   ;;  %v843_v18 = vld [vmem:[#allocation5 + $0x68] ss:$12 sps:$4 sm:$0xff]   ;;  %v837_v20 = vld [vmem:[#allocation5 + $0x4] ss:$12 sps:$4 sm:$0xff]  }
  0x30   :  { %246 = vmatpush1.bf16.msra.mxu0 %v821_v5  ;;  %v844_v21 = vld [vmem:[#allocation5 + $0x50] ss:$12 sps:$4 sm:$0xff]   ;;  %v839_v22 = vld [vmem:[#allocation5] ss:$12 sps:$4 sm:$0xff]   ;;  %v845_v26 = vld [vmem:[#allocation5 + $0x38] ss:$12 sps:$4 sm:$0xff]  }
  0x31   :  { %247 = vmatprep.subr.bf16.mxu0 %v822_v6  ;;  %742 = vmatpush3.bf16.msra.mxu1 %v841_v12  ;;  %v63_v23 = vld [vmem:[#allocation2] sm:$0xff]  ;;  %v64_v24 = vld [vmem:[#allocation2 + $0x8] sm:$0xff]  ;;  %v846_v27 = vld [vmem:[#allocation5 + $0x20] ss:$12 sps:$4 sm:$0xff]   ;;  %vm965_vm0 = vmmov 0   ;;  %v101_v30 = vshrl.u32 %v100_v29, 7 }
  0x32   :  { %743 = vmatprep.subr.bf16.mxu1 %v964_v1  ;;  %v65_v25 = vpack.c.bf16 %v64_v24, %v63_v23  ;;  %v847_v28 = vld [vmem:[#allocation5 + $0x8] ss:$12 sps:$4 sm:$0xff]   ;;  %755 = vmatprep.mubr.msk.bf16.mxu1 %vm965_vm0, %v964_v1  ;;  %v98_v33 = vld [vmem:[%s1061_s2] sm:$0x7]  ;;  %vm449_vm1 = vcmask 1043456   ;;  %vm415_vm2 = vcmask 64512  }
  0x33   :  { %v106_v31 = vsub.s32 1, %v101_v30  ;;  %v102_v32 = vsub.s32 0, %v101_v30  ;;  %v110_v50 = vsub.s32 2, %v101_v30  ;;  %v850_v23 = vld [vmem:[#allocation7 + $0x28] sm:$0xff]   ;;  %v851_v24 = vld [vmem:[#allocation7 + $0x20] sm:$0xff]   ;;  %s966_s14 = smov [#allocation8]  }
  0x34   :  { %248 = vmatpush1.bf16.msra.mxu0 %v824_v7  ;;  %s665_s15 = sshll.u32 %s966_s14, 4  ;;  %s666_s15 = int_to_ptr.vmem [resolvable:$true] %s665_s15 }
  0x35   :  { %249 = vmatprep.subr.bf16.mxu0 %v825_v8  ;;  %744 = vmatpush3.bf16.msra.mxu1 %v842_v15  ;;  %v107_v34 = vrot.slane %v98_v33, %v106_v31  ;;  %v103_v35 = vrot.slane %v98_v33, %v102_v32  ;;  %v111_v51 = vrot.slane %v98_v33, %v110_v50  ;;  %s928_s16 = scalar_lea.vmem %s666_s15, 256  ;;  %p933_p2 = scmp.lt.s32.totalorder %s666_s15, %s666_s15 }
  0x36   :  { %745 = vmatprep.subr.bf16.mxu1 %v964_v1  ;;  %p929_p1 = scmp.ne.s32.totalorder %s666_s15, %s928_s16  ;;  %p934_p3 = scmp.lt.s32.totalorder %s928_s16, %s928_s16 }
  0x38   :  { %250 = vmatpush1.bf16.msra.mxu0 %v827_v9  ;;  %p935_p4 = por %p934_p3, %p933_p2 }
  0x39   :  { %251 = vmatprep.subr.bf16.mxu0 %v828_v10  ;;  %746 = vmatpush3.bf16.msra.mxu1 %v843_v18 }
  0x3a   :  { %747 = vmatprep.subr.bf16.mxu1 %v964_v1  ;;  %p936_p5 = pnand %p935_p4, %p929_p1 }
  0x3c   :  { %252 = vmatpush1.bf16.msra.mxu0 %v830_v13 }
  0x3d   :  { %253 = vmatprep.subr.bf16.mxu0 %v831_v14  ;;  %748 = vmatpush3.bf16.msra.mxu1 %v844_v21  ;;  %v848_v21 = vld [vmem:[#allocation7 + $0x38] sm:$0xff]  }
  0x3e   :  { %749 = vmatprep.subr.bf16.mxu1 %v964_v1 }
  0x40   :  { %254 = vmatpush1.bf16.msra.mxu0 %v833_v16 }
  0x41   :  { %255 = vmatprep.subr.bf16.mxu0 %v834_v17  ;;  %750 = vmatpush3.bf16.msra.mxu1 %v845_v26  ;;  %v853_v26 = vld [vmem:[#allocation7 + $0x10] sm:$0xff]  }
  0x42   :  { %751 = vmatprep.subr.bf16.mxu1 %v964_v1 }
  0x44   :  { %256 = vmatpush1.bf16.msra.mxu0 %v836_v19 }
  0x45   :  { %257 = vmatprep.subr.bf16.mxu0 %v837_v20  ;;  %752 = vmatpush3.bf16.msra.mxu1 %v846_v27  ;;  %v854_v27 = vld [vmem:[#allocation7 + $0x8] sm:$0xff]  }
  0x46   :  { %753 = vmatprep.subr.bf16.mxu1 %v964_v1 }
  0x48   :  { %258 = vmatpush1.bf16.msra.mxu0 %v839_v22  ;;  %v849_v22 = vld [vmem:[#allocation7 + $0x30] sm:$0xff]  }
  0x49   :  { %783 = vmatprep.subr.bf16.mxu0 %v964_v1  ;;  %754 = vmatpush3.bf16.msra.mxu1 %v847_v28  ;;  %v855_v28 = vld [vmem:[#allocation7] sm:$0xff]  }
  0x4a   :  { %759 = vmatprep.subr.bf16.mxu1 %v964_v1 }
  0x4b   :  { %276 = vmatmul.mubr.bf16.vlgmr.msra.gmra.mxu0 %v65_v25 }
  0x4c   :  { %799 = vmatprep.mubr.msk.bf16.mxu0 %vm965_vm0, %v964_v1  ;;  %756 = vmatmul.mubr.bf16.vlgmr.msra.gmra.mxu1 %v65_v25  ;;  %v852_v25 = vld [vmem:[#allocation7 + $0x18] sm:$0xff]  }
  0x4d   :  { %761 = vmatprep.mubr.msk.bf16.mxu1 %vm965_vm0, %v964_v1  ;;  %784 = vmatpush3.bf16.msra.mxu0 %v848_v21 }
  0x4e   :  { %785 = vmatprep.subr.bf16.mxu0 %v964_v1 }
  0x51   :  { %786 = vmatpush3.bf16.msra.mxu0 %v849_v22 }
  0x52   :  { %787 = vmatprep.subr.bf16.mxu0 %v964_v1 }
  0x55   :  { %788 = vmatpush3.bf16.msra.mxu0 %v850_v23 }
  0x56   :  { %789 = vmatprep.subr.bf16.mxu0 %v964_v1 }
  0x59   :  { %790 = vmatpush3.bf16.msra.mxu0 %v851_v24 }
  0x5a   :  { %791 = vmatprep.subr.bf16.mxu0 %v964_v1 }
  0x5d   :  { %792 = vmatpush3.bf16.msra.mxu0 %v852_v25 }
  0x5e   :  { %793 = vmatprep.subr.bf16.mxu0 %v964_v1 }
  0x61   :  { %794 = vmatpush3.bf16.msra.mxu0 %v853_v26 }
  0x62   :  { %795 = vmatprep.subr.bf16.mxu0 %v964_v1 }
  0x65   :  { %796 = vmatpush3.bf16.msra.mxu0 %v854_v27 }
  0x66   :  { %797 = vmatprep.subr.bf16.mxu0 %v964_v1 }
  0x69   :  { %798 = vmatpush3.bf16.msra.mxu0 %v855_v28 }
 0x10b   :  { %v277_v36 = vpop.f32.mrf.mxu0 }
 0x10c   :  { %v278_v39 = vadd.f32 %v277_v36, %v103_v35  ;;  %v320_v52 = vpop.f32.mrf.mxu1 }
 0x10d   :  { %v279_v37 = vpop.f32.mrf.mxu0  ;;  %v321_v53 = vadd.f32 %v320_v52, %v111_v51 }
 0x10e   :  { %v280_v38 = vadd.f32 %v279_v37, %v107_v34  ;;  %v327_v43 = vmul.f32 0.25, %v278_v39  ;;  %v757_v54 = vpop.f32.mrf.mxu1 }
 0x10f   :  { %v281_v40 = vpop.f32.mrf.mxu0  ;;  %v333_v55 = vpack.c.bf16 %v321_v53, %v321_v53 }
 0x110   :  { %v331_v41 = vpack.c.bf16 %v280_v38, %v280_v38  ;;  %v329_v45 = vpack.c.bf16 %v327_v43, %v327_v43  ;;  %v282_v46 = vadd.f32 %v281_v40, %v103_v35  ;;  %v323_v56 = vpop.f32.mrf.mxu1 }
 0x111   :  { %v283_v42 = vpop.f32.mrf.mxu0  ;;  %v451_v57 = vsel %vm449_vm1, %v333_v55, 0  ;;  %v324_v58 = vadd.f32 %v323_v56, %v111_v51  ;;  %v704_v55 = vld [vmem:[%s1063_s4] ss:$0 sm:$0xff] }
 0x112   :  { %760 = vmatpush3.bf16.xpose.msra.mxu1 %v331_v41  ;;  %v284_v44 = vadd.f32 %v283_v42, %v107_v34  ;;  %v328_v48 = vmul.f32 0.25, %v282_v46  ;;  %v758_v59 = vpop.f32.mrf.mxu1 }
 0x113   :  { %765 = vmatprep.subr.bf16.mxu1 %v964_v1  ;;  %v334_v60 = vpack.c.bf16 %v324_v58, %v324_v58 }
 0x114   :  { %v332_v47 = vpack.c.bf16 %v284_v44, %v284_v44  ;;  %v330_v49 = vpack.c.bf16 %v328_v48, %v328_v48 }
 0x115   :  { %v497_v61 = vsel %vm449_vm1, %v334_v60, 0 }
 0x119   :  { %762 = vmatmul.mubr.bf16.vlgmr.msra.gmra.mxu1 %v329_v45 }
 0x11a   :  { %766 = vmatpush3.bf16.xpose.msra.mxu1 %v332_v47  ;;  %767 = vmatprep.mubr.msk.bf16.mxu1 %vm965_vm0, %v964_v1 }
 0x11b   :  { %771 = vmatprep.subr.bf16.mxu1 %v964_v1 }
 0x121   :  { %768 = vmatmul.mubr.bf16.vlgmr.msra.gmra.mxu1 %v330_v49 }
 0x122   :  { %773 = vmatprep.mubr.msk.bf16.mxu1 %vm965_vm0, %v964_v1  ;;  %772 = vmatpush3.bf16.msra.mxu1 %v451_v57 }
 0x123   :  { %777 = vmatprep.subr.bf16.mxu1 %v964_v1 }
 0x1d9   :  { %v369_v62 = vpop.f32.mrf.mxu1 }
 0x1da   :  { %v416_v63 = vsel %vm415_vm2, %v369_v62, -inf }
 0x1db   :  { %417 = vmax.xlane.f32.xlu0 %v416_v63  ;;  %v763_v0 = vpop.f32.mrf.mxu1 }
 0x1dd   :  { %v372_v2 = vpop.f32.mrf.mxu1 }
 0x1df   :  { %v764_v3 = vpop.f32.mrf.mxu1 }
 0x1e1   :  { %v409_v4 = vpop.f32.mrf.mxu1 }
 0x1e2   :  { %v419_v5 = vsel %vm415_vm2, %v409_v4, -inf }
 0x1e3   :  { %420 = vmax.xlane.f32.xlu0 %v419_v5  ;;  %v769_v6 = vpop.f32.mrf.mxu1 }
 0x1e5   :  { %v412_v7 = vpop.f32.mrf.mxu1 }
 0x1e7   :  { %v770_v8 = vpop.f32.mrf.mxu1 }
 0x264   :  { %v418_v9 = vpop.xlane.xlu0 %417 }
 0x265   :  { %v428_v10 = vsub.f32 %v369_v62, %v418_v9  ;;  %v422_v29 = vsub.f32 -inf, %v418_v9 }
 0x267   :  { %v430_v11 = vmul.f32 1.442695, %v428_v10  ;;  %v424_v31 = vmul.f32 1.442695, %v422_v29 }
 0x269   :  { %856 = vpow2.f32 %v430_v11 }
 0x26c   :  { %v421_v12 = vpop.xlane.xlu0 %420 }
 0x26d   :  { %v429_v13 = vsub.f32 %v409_v4, %v421_v12  ;;  %v423_v30 = vsub.f32 -inf, %v421_v12 }
 0x26f   :  { %v432_v14 = vmul.f32 1.442695, %v429_v13  ;;  %v426_v32 = vmul.f32 1.442695, %v423_v30 }
 0x271   :  { %858 = vpow2.f32 %v432_v14 }
 0x272   :  { %860 = vpow2.f32 %v424_v31 }
 0x273   :  { %862 = vpow2.f32 %v426_v32 }
 0x276   :  { %v857_v15 = vpop.eup %856 }
 0x277   :  { %v436_v16 = vsel %vm415_vm2, %v857_v15, 0.0  ;;  %v444_v17 = vpack.c.bf16 %v857_v15, %v857_v15 }
 0x278   :  { %437 = vadd.xlane.f32.xlu1 %v436_v16 }
 0x279   :  { %774 = vmatmul.mubr.msk.bf16.vlgmr.msra.gmra.mxu1 %vm415_vm2, %v444_v17 }
 0x27a   :  { %778 = vmatpush3.bf16.msra.mxu1 %v497_v61  ;;  %779 = vmatprep.mubr.msk.bf16.mxu1 %vm965_vm0, %v964_v1 }
 0x27e   :  { %v859_v18 = vpop.eup %858 }
 0x27f   :  { %v439_v19 = vsel %vm415_vm2, %v859_v18, 0.0  ;;  %v445_v20 = vpack.c.bf16 %v859_v18, %v859_v18  ;;  %v861_v34 = vpop.eup %860 }
 0x280   :  { %440 = vadd.xlane.f32.xlu1 %v439_v19  ;;  %v863_v35 = vpop.eup %862  ;;  %v434_v36 = vmul.f32 0.0, %v861_v34 }
 0x281   :  { %780 = vmatmul.mubr.msk.bf16.vlgmr.msra.gmra.mxu1 %vm415_vm2, %v445_v20  ;;  %v435_v38 = vmul.f32 0.0, %v863_v35 }
 0x301   :  { %v438_v33 = vpop.xlane.xlu1 %437 }
 0x302   :  { %v442_v39 = vadd.f32 %v438_v33, %v434_v36 }
 0x304   :  { %864 = vrcp.f32 %v442_v39 }
 0x309   :  { %v441_v37 = vpop.xlane.xlu1 %440 }
 0x30a   :  { %v443_v40 = vadd.f32 %v441_v37, %v435_v38 }
 0x30c   :  { %866 = vrcp.f32 %v443_v40 }
 0x311   :  { %v865_v46 = vpop.eup %864 }
 0x319   :  { %v867_v48 = vpop.eup %866 }
 0x339   :  { %v487_v41 = vpop.f32.mrf.mxu1 }
 0x33a   :  { %v539_v44 = vadd.f32 %v487_v41, %v434_v36 }
 0x33b   :  { %v775_v1 = vpop.f32.mrf.mxu1 }
 0x33c   :  { %v543_v50 = vmul.f32 %v865_v46, %v539_v44 }
 0x33d   :  { %v490_v42 = vpop.f32.mrf.mxu1 }
 0x33f   :  { %v776_v43 = vpop.f32.mrf.mxu1 }
 0x341   :  { %v533_v45 = vpop.f32.mrf.mxu1 }
 0x342   :  { %v540_v47 = vadd.f32 %v533_v45, %v435_v38 }
 0x343   :  { %v781_v49 = vpop.f32.mrf.mxu1 }
 0x344   :  { %v544_v51 = vmul.f32 %v867_v48, %v540_v47 }
 0x345   :  { %v536_v52 = vpop.f32.mrf.mxu1 }
 0x346   :  { %v545_v53 = vpack.c.bf16 %v544_v51, %v543_v50 }
 0x347   :  { %v782_v54 = vpop.f32.mrf.mxu1 }
 0x348   :  { %800 = vmatmul.mubr.bf16.vlgmr.msra.gmra.mxu0 %v545_v53 }
 0x408   :  { %v651_v56 = vpop.f32.mrf.mxu0 }
 0x409   :  { %v652_v57 = vadd.f32 %v704_v55, %v651_v56 }
 0x40a   :  { %v801_v58 = vpop.f32.mrf.mxu0 }
 0x40b   :  { %658 = vst [vmem:[#allocation8] sm:$0xff] %v652_v57 }
 0x40c   :  { %v654_v59 = vpop.f32.mrf.mxu0 }
 0x40d   :  { %v655_v60 = vadd.f32 %v704_v55, %v654_v59 }
 0x40e   :  { %v802_v61 = vpop.f32.mrf.mxu0 }
 0x40f   :  { %659 = vst [vmem:[#allocation8 + $0x8] sm:$0xff] %v655_v60 }
 0x410   :  { %939 = shalt.err (!%p936_p5)
}
 0x411   :  { %671 = dma.vmem_to_hbm [thread:$0]  %s666_s15, 256, %s1064_s5, [#allocation4], %s958_s28, %s958_s28, %s959_s29  }
 0x412   :  { %952 = dma.done.wait [#allocation4], 256  }
 0x413   :  { %953 = vsyncadd [#allocation4], 4294967040 }
 0x414   :  { %675 = vsyncpa [#allocation3], 1 }
 0x415   :  { %676 = vsyncpa [#allocation6], 1 }
 0x416   :  { %677 = vsyncpa [#allocation4], 1 }

</bundles_post_ra>
